<compile_context>
chip_gen: v5e
topology: v5e:2x2
jax: 0.10.0
libtpu: 0.0.40
codegen_flags: <defaults>
</compile_context>

<pallas_src>
import functools

import jax
import jax.numpy as jnp
from jax.experimental import pallas as pl
from jax.experimental.pallas import tpu as pltpu

# ---- static problem sizes (small, consistent with the module) ----
B = 2           # batch
V = 128         # vocab size of wte
D = 128         # embedding dim
N_TOKENS = 8    # number of soft-prompt tokens
S = 24          # total input sequence length (tokens), S >= N_TOKENS


def _round_up(x, m):
    return (x + m - 1) // m * m


def soft_embedding_kernel(tok_ref, pos_ref, table_ref, out_ref, *,
                          n_tokens, n_rows, n_table):
    # tok_ref:   (R, 1)            int32  token id for every (batch, position) row
    # pos_ref:   (R, 1)            int32  position-within-sequence for every row
    # table_ref: (N_TOKENS + V, D) f32    fused [learned soft prompt ; wte] table
    # out_ref:   (R, D)            f32    flattened output rows (lane-dense, D = 128)
    # R = B*S rounded up to a sublane multiple; padded rows carry id -1 -> zero one-hot.
    tok = tok_ref[...]
    pos = pos_ref[...]

    # Fused row selection: positions < n_tokens take learned row `pos`,
    # the remaining positions take vocab row `token_id` (offset by n_tokens).
    ids = jnp.where(pos < n_tokens, pos, tok + n_tokens)                 # (R, 1)

    # Lane-dense one-hot and a single batched MXU gather for ALL rows at once.
    col = jax.lax.broadcasted_iota(jnp.int32, (n_rows, n_table), 1)      # (R, VT)
    onehot = (col == ids).astype(table_ref.dtype)                        # (R, VT)
    out_ref[...] = jnp.dot(
        onehot, table_ref[...], preferred_element_type=jnp.float32
    ).astype(out_ref.dtype)                                              # (R, D)


def soft_embedding(tokens, wte_weight, learned_embedding):
    """tokens: [B, S] int; wte_weight: [V, D] f32; learned: [N_TOKENS, D] f32
    returns [B, S, D] f32 == cat([learned.repeat(B,1,1), wte(tokens[:, N_TOKENS:])], 1)"""
    b, s = tokens.shape
    v, d = wte_weight.shape
    n_tokens = learned_embedding.shape[0]
    n_rows = b * s
    n_rows_pad = _round_up(n_rows, 8)          # sublane-aligned row count
    n_table = n_tokens + v

    # Wrapper-side layout plumbing only (no embedding compute is hoisted):
    # fused gather table plus flattened per-row token-id / position columns,
    # padded to a sublane multiple (pad rows use pos = -1 / tok = -1 -> zero rows,
    # sliced off below; here n_rows is already a multiple of 8 so this is a no-op).
    table = jnp.concatenate([learned_embedding, wte_weight], axis=0)        # (VT, D)
    tok_col = tokens.astype(jnp.int32).reshape(n_rows, 1)                   # (B*S, 1)
    pos_col = jnp.tile(jnp.arange(s, dtype=jnp.int32), b).reshape(n_rows, 1)
    if n_rows_pad != n_rows:
        pad = ((0, n_rows_pad - n_rows), (0, 0))
        tok_col = jnp.pad(tok_col, pad, constant_values=-1)
        pos_col = jnp.pad(pos_col, pad, constant_values=-1)

    kernel = functools.partial(
        soft_embedding_kernel,
        n_tokens=n_tokens, n_rows=n_rows_pad, n_table=n_table,
    )
    out = pl.pallas_call(
        kernel,
        # No grid: the whole problem (48x136 @ 136x128) is one invocation — cheaper
        # than paying per-grid-step pipeline overhead for tiny per-batch matmuls.
        # For large B*S, tile the row dimension in blocks of >=128 with a "parallel"
        # grid axis; for large V, switch to a scalar-prefetch row gather instead.
        out_shape=jax.ShapeDtypeStruct((n_rows_pad, d), wte_weight.dtype),
        in_specs=[
            pl.BlockSpec(memory_space=pltpu.MemorySpace.VMEM),   # token ids
            pl.BlockSpec(memory_space=pltpu.MemorySpace.VMEM),   # positions
            pl.BlockSpec(memory_space=pltpu.MemorySpace.VMEM),   # fused table
        ],
        out_specs=pl.BlockSpec(memory_space=pltpu.MemorySpace.VMEM),
    )(tok_col, pos_col, table)
    return out[:n_rows].reshape(b, s, d)


if __name__ == "__main__":
    key = jax.random.PRNGKey(0)
    k_wte, k_tok = jax.random.split(key)

    # Deterministic parameter init. learned_embedding is taken from the first
    # N_TOKENS vocab rows, matching initialize_from_vocab=True in the PyTorch module.
    wte_weight = jax.random.normal(k_wte, (V, D), dtype=jnp.float32)
    learned_embedding = wte_weight[:N_TOKENS]

    tokens = jax.random.randint(k_tok, (B, S), 0, V, dtype=jnp.int32)

    out = soft_embedding(tokens, wte_weight, learned_embedding)
    out = jax.block_until_ready(out)

    # Pure-JAX reference check.
    ref_gather = jnp.take(wte_weight, tokens[:, N_TOKENS:], axis=0)        # [B, S-n, D]
    ref_learned = jnp.broadcast_to(learned_embedding[None], (B, N_TOKENS, D))
    ref = jnp.concatenate([ref_learned, ref_gather], axis=1)               # [B, S, D]
    assert out.shape == (B, S, D)
    assert jnp.allclose(out, ref, atol=1e-6, rtol=1e-6)

    print("KERNEL_OK")
</pallas_src>

<mosaic_0001>
module attributes {stable_mosaic.version = 11 : i64} {
  func.func @soft_embedding_kernel(%arg0: memref<48x1xi32, #tpu.memory_space<vmem>>, %arg1: memref<48x1xi32, #tpu.memory_space<vmem>>, %arg2: memref<136x128xf32, #tpu.memory_space<vmem>>, %arg3: memref<48x128xf32, #tpu.memory_space<vmem>>) attributes {dimension_semantics = [], scalar_prefetch = 0 : i64, scratch_operands = 0 : i64, tpu.core_type = #tpu.core_type<tc>} {
    %c0 = arith.constant 0 : index
    %c0_0 = arith.constant 0 : index
    %0 = vector.load %arg0[%c0, %c0_0] : memref<48x1xi32, #tpu.memory_space<vmem>>, vector<48x1xi32>
    %c0_1 = arith.constant 0 : index
    %c0_2 = arith.constant 0 : index
    %1 = vector.load %arg1[%c0_1, %c0_2] : memref<48x1xi32, #tpu.memory_space<vmem>>, vector<48x1xi32>
    %c8_i32 = arith.constant 8 : i32
    %2 = vector.broadcast %c8_i32 : i32 to vector<48x1xi32>
    %3 = arith.cmpi slt, %1, %2 : vector<48x1xi32>
    %c8_i32_3 = arith.constant 8 : i32
    %4 = vector.broadcast %c8_i32_3 : i32 to vector<48x1xi32>
    %5 = arith.addi %0, %4 : vector<48x1xi32>
    %6 = arith.select %3, %1, %5 : vector<48x1xi1>, vector<48x1xi32>
    %7 = tpu.iota {dimensions = array<i32: 1>} : vector<48x136xi32>
    %8 = vector.broadcast %6 : vector<48x1xi32> to vector<48x136xi32>
    %9 = arith.cmpi eq, %7, %8 : vector<48x136xi32>
    %10 = arith.extui %9 : vector<48x136xi1> to vector<48x136xi32>
    %11 = arith.sitofp %10 : vector<48x136xi32> to vector<48x136xf32>
    %c0_4 = arith.constant 0 : index
    %c0_5 = arith.constant 0 : index
    %12 = vector.load %arg2[%c0_4, %c0_5] : memref<136x128xf32, #tpu.memory_space<vmem>>, vector<136x128xf32>
    %cst = arith.constant dense<0.000000e+00> : vector<48x128xf32>
    %13 = tpu.matmul %11, %12, %cst {dimension_numbers = #tpu.dot_dimension_numbers<[1], [0], [0], [1], [0, 0, 1, 1], [], []>} : vector<48x136xf32>, vector<136x128xf32>, vector<48x128xf32> -> vector<48x128xf32>
    %c0_6 = arith.constant 0 : index
    %c0_7 = arith.constant 0 : index
    %14 = vector.load %arg3[%c0_6, %c0_7] : memref<48x128xf32, #tpu.memory_space<vmem>>, vector<48x128xf32>
    tpu.vector_store %arg3[%c0_6, %c0_7], %13 {strides = array<i32>} : memref<48x128xf32, #tpu.memory_space<vmem>>, vector<48x128xf32>,
    return
  }
}

</mosaic_0001>

<bundles_post_ra>
// kernel: tpu_custom_call.1
= control target key start
LH: loop header
LB: loop body
LE: loop exit
PB: predicated region body
PF: predicated region fallthrough
CT: control target
= control target key end

     0   :  { %8 = vsyncpa [#allocation3], 0  ;;  %s448_s0 = inlined_call_operand.vmem [shape: s32[48,1], index: 0, kind: input, shape index: {}]   ;;  %s449_s1 = inlined_call_operand.vmem [shape: s32[48,1], index: 1, kind: input, shape index: {}]   ;;  %s450_s2 = inlined_call_operand.hbm [shape: f32[136,128], index: 2, kind: input, shape index: {}]   ;;  %s451_s3 = inlined_call_operand.hbm [shape: f32[48,128], index: 3, kind: output, shape index: {}]  }
   0x1   :  { %9 = vsyncpa [#allocation4], 0  ;;  %s18_s14 = sshll.u32 %s450_s2, 4  ;;  %s367_s15 = smov [#allocation2]   ;;  %s19_s14 = int_to_ptr.hbm [resolvable:$true] %s18_s14 }
   0x2   :  { %s20_s16 = sshll.u32 %s367_s15, 4  ;;  %s368_s17 = smov 128   ;;  %s21_s16 = int_to_ptr.vmem [resolvable:$true] %s20_s16 }
   0x3   :  { %s369_s18 = smov 8  }
   0x4   :  { %26 = dma.hbm_to_vmem [thread:$0]  %s19_s14, 2176, %s21_s16, [#allocation3], %s368_s17, %s368_s17, %s369_s18  }
   0x5   :  { %363 = dma.done.wait [#allocation3], 2176  }
   0x6   :  { %364 = vsyncadd [#allocation3], 4294965120  ;;  %v370_v0 = vmov 0   ;;  %v31_v1 = vld [vmem:[%s448_s0] sm:$0xff]  ;;  %v33_v3 = vld [vmem:[%s448_s0 + $0x10] sm:$0xff]  ;;  %v61_v43 = vlaneseq  ;;  %v371_v45 = vmov 1.0  }
   0x7   :  { %312 = vset.pattern.permute.xlu0 %v370_v0  ;;  %313 = vset.pattern.permute.xlu1 %v370_v0  ;;  %v37_v2 = vld [vmem:[%s449_s1] sm:$0xff]  ;;  %v49_v4 = vadd.s32 8, %v31_v1  ;;  %v39_v5 = vld [vmem:[%s449_s1 + $0x10] sm:$0xff]  ;;  %v51_v6 = vadd.s32 8, %v33_v3  ;;  %v32_v7 = vld [vmem:[%s448_s0 + $0x8] sm:$0xff]  ;;  %vm135_vm8 = vcmask 64512  }
   0x8   :  { %314 = vset.pattern.permute.xlu2 %v370_v0  ;;  %vm43_vm0 = vcmp.lt.s32.totalorder %v37_v2, 8  ;;  %vm45_vm1 = vcmp.lt.s32.totalorder %v39_v5, 8  ;;  %v34_v8 = vld [vmem:[%s448_s0 + $0x18] sm:$0xff]  ;;  %v35_v9 = vld [vmem:[%s448_s0 + $0x20] sm:$0xff]  ;;  %v38_v12 = vld [vmem:[%s449_s1 + $0x8] sm:$0xff]  ;;  %v50_v18 = vadd.s32 8, %v32_v7 }
   0x9   :  { %v55_v10 = vsel %vm43_vm0, %v37_v2, %v49_v4  ;;  %v57_v11 = vsel %vm45_vm1, %v39_v5, %v51_v6  ;;  %v40_v13 = vld [vmem:[%s449_s1 + $0x18] sm:$0xff]  ;;  %v41_v14 = vld [vmem:[%s449_s1 + $0x20] sm:$0xff]  ;;  %v53_v15 = vadd.s32 8, %v35_v9  ;;  %v132_v17 = vld [vmem:[#allocation2 + $0x70] sm:$0xff]  ;;  %v52_v19 = vadd.s32 8, %v34_v8  ;;  %s236_s19 = sshll.u32 %s451_s3, 4  ;;  %s237_s19 = int_to_ptr.hbm [resolvable:$true] %s236_s19 }
   0xa   :  { %65 = vperm.xlu0 %312, %v55_v10   ;;  %71 = vperm.xlu1 %313, %v57_v11   ;;  %vm47_vm2 = vcmp.lt.s32.totalorder %v41_v14, 8  ;;  %v133_v16 = vld [vmem:[#allocation2 + $0x78] sm:$0xff]  ;;  %v36_v20 = vld [vmem:[%s448_s0 + $0x28] sm:$0xff]  ;;  %vm44_vm3 = vcmp.lt.s32.totalorder %v38_v12, 8  ;;  %vm46_vm4 = vcmp.lt.s32.totalorder %v40_v13, 8  ;;  %v130_v25 = vld [vmem:[#allocation2 + $0x60] sm:$0xff] }
   0xb   :  { %154 = vmatpush.msra.mxu0 %v133_v16  ;;  %273 = vmatpush.msra.mxu2 %v133_v16  ;;  %v59_v21 = vsel %vm47_vm2, %v41_v14, %v53_v15  ;;  %v42_v22 = vld [vmem:[%s449_s1 + $0x28] sm:$0xff]  ;;  %v54_v24 = vadd.s32 8, %v36_v20  ;;  %v56_v26 = vsel %vm44_vm3, %v38_v12, %v50_v18  ;;  %v58_v27 = vsel %vm46_vm4, %v40_v13, %v52_v19  ;;  %v129_v28 = vld [vmem:[#allocation2 + $0x58] sm:$0xff]  ;;  %v128_v30 = vld [vmem:[#allocation2 + $0x50] sm:$0xff]  ;;  %s373_s0 = smov [#allocation5]  }
   0xc   :  { %v131_v23 = vld [vmem:[#allocation2 + $0x68] sm:$0xff]  ;;  %274 = vmatpush.msra.mxu3 %v133_v16  ;;  %77 = vperm.xlu2 %314, %v59_v21   ;;  %vm48_vm5 = vcmp.lt.s32.totalorder %v42_v22, 8  ;;  %v126_v32 = vld [vmem:[#allocation2 + $0x40] sm:$0xff]  ;;  %v125_v33 = vld [vmem:[#allocation2 + $0x38] sm:$0xff]  ;;  %v62_v44 = vand.u32 127, %v61_v43  ;;  %v372_v50 = vmov 0.0  }
   0xd   :  { %155 = vmatpush.msra.mxu0 %v132_v17  ;;  %275 = vmatpush.msra.mxu2 %v132_v17  ;;  %v60_v29 = vsel %vm48_vm5, %v42_v22, %v54_v24  ;;  %v127_v31 = vld [vmem:[#allocation2 + $0x48] sm:$0xff]  ;;  %v124_v34 = vld [vmem:[#allocation2 + $0x30] sm:$0xff]  ;;  %v122_v36 = vld [vmem:[#allocation2 + $0x20] sm:$0xff]  ;;  %s234_s1 = sshll.u32 %s373_s0, 4  ;;  %s235_s1 = int_to_ptr.vmem [resolvable:$true] %s234_s1 }
   0xe   :  { %276 = vmatpush.msra.mxu3 %v132_v17  ;;  %v123_v35 = vld [vmem:[#allocation2 + $0x28] sm:$0xff]  ;;  %v121_v37 = vld [vmem:[#allocation2 + $0x18] sm:$0xff]  ;;  %v120_v38 = vld [vmem:[#allocation2 + $0x10] sm:$0xff]  ;;  %v63_v47 = vadd.s32 128, %v62_v44 }
   0xf   :  { %156 = vmatpush.msra.mxu0 %v131_v23  ;;  %277 = vmatpush.msra.mxu2 %v131_v23  ;;  %v119_v39 = vld [vmem:[#allocation2 + $0x8] sm:$0xff]  ;;  %v118_v40 = vld [vmem:[#allocation2] sm:$0xff] }
  0x10   :  { %278 = vmatpush.msra.mxu3 %v131_v23  ;;  %v134_v41 = vld [vmem:[#allocation2 + $0x80] sm:$0xff] }
  0x11   :  { %157 = vmatpush.msra.mxu0 %v130_v25  ;;  %279 = vmatpush.msra.mxu2 %v130_v25 }
  0x12   :  { %68 = vperm.xlu0 %312, %v56_v26   ;;  %74 = vperm.xlu1 %313, %v58_v27  }
  0x13   :  { %158 = vmatpush.msra.mxu0 %v129_v28  ;;  %280 = vmatpush.msra.mxu3 %v130_v25 }
  0x14   :  { %80 = vperm.xlu2 %314, %v60_v29   ;;  %281 = vmatpush.msra.mxu2 %v129_v28 }
  0x15   :  { %159 = vmatpush.msra.mxu0 %v128_v30  ;;  %282 = vmatpush.msra.mxu3 %v129_v28 }
  0x16   :  { %283 = vmatpush.msra.mxu2 %v128_v30  ;;  %204 = vmatpush.msra.mxu1 %v134_v41 }
  0x17   :  { %160 = vmatpush.msra.mxu0 %v127_v31  ;;  %284 = vmatpush.msra.mxu3 %v128_v30 }
  0x18   :  { %285 = vmatpush.msra.mxu2 %v127_v31 }
  0x19   :  { %161 = vmatpush.msra.mxu0 %v126_v32  ;;  %286 = vmatpush.msra.mxu3 %v127_v31 }
  0x1a   :  { %287 = vmatpush.msra.mxu2 %v126_v32 }
  0x1b   :  { %162 = vmatpush.msra.mxu0 %v125_v33  ;;  %288 = vmatpush.msra.mxu3 %v126_v32 }
  0x1c   :  { %289 = vmatpush.msra.mxu2 %v125_v33 }
  0x1d   :  { %163 = vmatpush.msra.mxu0 %v124_v34  ;;  %290 = vmatpush.msra.mxu3 %v125_v33 }
  0x1e   :  { %291 = vmatpush.msra.mxu2 %v124_v34 }
  0x1f   :  { %164 = vmatpush.msra.mxu0 %v123_v35  ;;  %292 = vmatpush.msra.mxu3 %v124_v34 }
  0x20   :  { %293 = vmatpush.msra.mxu2 %v123_v35 }
  0x21   :  { %165 = vmatpush.msra.mxu0 %v122_v36  ;;  %294 = vmatpush.msra.mxu3 %v123_v35 }
  0x22   :  { %295 = vmatpush.msra.mxu2 %v122_v36 }
  0x23   :  { %166 = vmatpush.msra.mxu0 %v121_v37  ;;  %296 = vmatpush.msra.mxu3 %v122_v36 }
  0x24   :  { %297 = vmatpush.msra.mxu2 %v121_v37 }
  0x25   :  { %167 = vmatpush.msra.mxu0 %v120_v38  ;;  %298 = vmatpush.msra.mxu3 %v121_v37 }
  0x26   :  { %299 = vmatpush.msra.mxu2 %v120_v38 }
  0x27   :  { %168 = vmatpush.msra.mxu0 %v119_v39  ;;  %300 = vmatpush.msra.mxu3 %v120_v38 }
  0x28   :  { %301 = vmatpush.msra.mxu2 %v119_v39 }
  0x29   :  { %302 = vmatpush.msra.mxu3 %v119_v39  ;;  %169 = vmatpush.msra.mxu0 %v118_v40 }
  0x2a   :  { %303 = vmatpush.msra.mxu2 %v118_v40 }
  0x2b   :  { %304 = vmatpush.msra.mxu3 %v118_v40 }
  0x66   :  { %v78_v42 = vpop.permute.xlu2 %77 }
  0x67   :  { %vm90_vm6 = vcmp.eq.s32.totalorder %v62_v44, %v78_v42  ;;  %vm91_vm1 = vcmp.eq.s32.totalorder %v63_v47, %v78_v42 }
  0x68   :  { %265 = vmatmul.msk.f32.vlgmr.msra.gmra.mxu3 %vm90_vm6, %v371_v45  ;;  %v258_v57 = vsel %vm91_vm1, 1.0, %v372_v50 }
  0x6e   :  { %v81_v46 = vpop.permute.xlu2 %80 }
  0x6f   :  { %vm92_vm7 = vcmp.eq.s32.totalorder %v62_v44, %v81_v46  ;;  %vm93_vm2 = vcmp.eq.s32.totalorder %v63_v47, %v81_v46 }
  0x70   :  { %266 = vmatmul.msk.f32.gmra.mxu3 %vm92_vm7, %v371_v45  ;;  %v260_v58 = vsel %vm93_vm2, 1.0, %v372_v50 }
  0x7c   :  { %v66_v48 = vpop.permute.xlu0 %65  ;;  %v72_v49 = vpop.permute.xlu1 %71 }
  0x7d   :  { %vm83_vm9 = vcmp.eq.s32.totalorder %v63_v47, %v66_v48  ;;  %vm82_vm10 = vcmp.eq.s32.totalorder %v62_v44, %v66_v48  ;;  %vm86_vm11 = vcmp.eq.s32.totalorder %v62_v44, %v72_v49  ;;  %vm87_vm15 = vcmp.eq.s32.totalorder %v63_v47, %v72_v49 }
  0x7e   :  { %261 = vmatmul.msk.f32.vlgmr.msra.gmra.mxu0 %vm82_vm10, %v371_v45  ;;  %v250_v51 = vsel %vm83_vm9, 1.0, %v372_v50  ;;  %263 = vmatmul.msk.f32.vlgmr.msra.gmra.mxu2 %vm86_vm11, %v371_v45  ;;  %v254_v55 = vsel %vm87_vm15, 1.0, %v372_v50 }
  0x7f   :  { %267 = vmatmul.msk.f32.vlgmr.msra.gmra.mxu1 %vm135_vm8, %v250_v51 }
  0x84   :  { %v69_v52 = vpop.permute.xlu0 %68  ;;  %v75_v53 = vpop.permute.xlu1 %74 }
  0x85   :  { %vm84_vm12 = vcmp.eq.s32.totalorder %v62_v44, %v69_v52  ;;  %vm85_vm13 = vcmp.eq.s32.totalorder %v63_v47, %v69_v52  ;;  %vm88_vm14 = vcmp.eq.s32.totalorder %v62_v44, %v75_v53  ;;  %vm89_vm0 = vcmp.eq.s32.totalorder %v63_v47, %v75_v53 }
  0x86   :  { %v252_v54 = vsel %vm85_vm13, 1.0, %v372_v50  ;;  %262 = vmatmul.msk.f32.gmra.mxu0 %vm84_vm12, %v371_v45  ;;  %264 = vmatmul.msk.f32.gmra.mxu2 %vm88_vm14, %v371_v45  ;;  %v256_v56 = vsel %vm89_vm0, 1.0, %v372_v50 }
  0x87   :  { %268 = vmatmul.msk.f32.gmra.mxu1 %vm135_vm8, %v252_v54 }
  0x8f   :  { %269 = vmatmul.msk.f32.gmra.mxu1 %vm135_vm8, %v254_v55 }
  0x97   :  { %270 = vmatmul.msk.f32.gmra.mxu1 %vm135_vm8, %v256_v56 }
  0x9f   :  { %271 = vmatmul.msk.f32.gmra.mxu1 %vm135_vm8, %v258_v57 }
  0xa7   :  { %272 = vmatmul.msk.f32.gmra.mxu1 %vm135_vm8, %v260_v58 }
  0xeb   :  { %v183_v7 = vpop.f32.mrf.mxu3 }
  0xf3   :  { %v186_v10 = vpop.f32.mrf.mxu3 }
  0xfb   :  { %v171_v59 = vpop.f32.mrf.mxu0 }
  0xfc   :  { %v206_v60 = vpop.f32.mrf.mxu1 }
  0xfd   :  { %v207_v61 = vadd.f32 %v206_v60, %v171_v59 }
  0xff   :  { %224 = vst [vmem:[#allocation5] sm:$0xff] %v207_v61 }
 0x101   :  { %v177_v1 = vpop.f32.mrf.mxu2 }
 0x103   :  { %v174_v62 = vpop.f32.mrf.mxu0 }
 0x104   :  { %v209_v63 = vpop.f32.mrf.mxu1 }
 0x105   :  { %v210_v0 = vadd.f32 %v209_v63, %v174_v62 }
 0x107   :  { %225 = vst [vmem:[#allocation5 + $0x8] sm:$0xff] %v210_v0 }
 0x109   :  { %v180_v4 = vpop.f32.mrf.mxu2 }
 0x10c   :  { %v212_v2 = vpop.f32.mrf.mxu1 }
 0x10d   :  { %v213_v3 = vadd.f32 %v212_v2, %v177_v1 }
 0x10f   :  { %226 = vst [vmem:[#allocation5 + $0x10] sm:$0xff] %v213_v3 }
 0x114   :  { %v215_v5 = vpop.f32.mrf.mxu1 }
 0x115   :  { %v216_v6 = vadd.f32 %v215_v5, %v180_v4 }
 0x117   :  { %227 = vst [vmem:[#allocation5 + $0x18] sm:$0xff] %v216_v6 }
 0x11c   :  { %v218_v8 = vpop.f32.mrf.mxu1 }
 0x11d   :  { %v219_v9 = vadd.f32 %v218_v8, %v183_v7 }
 0x11f   :  { %228 = vst [vmem:[#allocation5 + $0x20] sm:$0xff] %v219_v9 }
 0x124   :  { %v221_v11 = vpop.f32.mrf.mxu1 }
 0x125   :  { %v222_v12 = vadd.f32 %v221_v11, %v186_v10 }
 0x127   :  { %229 = vst [vmem:[#allocation5 + $0x28] sm:$0xff] %v222_v12 }
 0x128   :  { %242 = dma.vmem_to_hbm [thread:$0]  %s235_s1, 768, %s237_s19, [#allocation4], %s368_s17, %s368_s17, %s369_s18  }
 0x129   :  { %365 = dma.done.wait [#allocation4], 768  }
 0x12a   :  { %366 = vsyncadd [#allocation4], 4294966528 }
 0x12b   :  { %247 = vsyncpa [#allocation3], 1 }
 0x12c   :  { %248 = vsyncpa [#allocation4], 1 }

</bundles_post_ra>
